<compile_context>
chip_gen: v6e
topology: v6e:2x2x1
jax: 0.10.0
libtpu: 0.0.40
codegen_flags: <defaults>
</compile_context>

<pallas_src>
import functools

import jax
import jax.numpy as jnp
from jax import lax
from jax.experimental import pallas as pl
from jax.experimental.pallas import tpu as pltpu

_LANES = 128
_MAX_TILE_ROWS = 1024   # 1024x128 f32 block = 512 KiB; 4 in x 2 buf + acc ~ 4.5 MiB


def _depth_loss_kernel(med_ref, db_ref, df_ref, ob_ref, of_ref, out_ref, acc_ref,
                       *, rows, tile_r, tiles_per_core, uniform,
                       inv_nb, inv_nf, inv_no, max_dist, max_off):
    c = pl.program_id(0)          # partial / TensorCore index ("parallel")
    i = pl.program_id(1)          # streaming reduction index ("arbitrary")

    @pl.when(i == 0)
    def _init():
        acc_ref[...] = jnp.zeros_like(acc_ref)

    med = med_ref[0]
    zero = jnp.float32(0.0)

    db = db_ref[...].astype(jnp.float32)
    df = df_ref[...].astype(jnp.float32)
    ob = ob_ref[...].astype(jnp.float32)
    of = of_ref[...].astype(jnp.float32)

    # relu(a) + relu(b) == max(a, b, 0) whenever a, b cannot both be positive,
    # which holds for these pairs when max_dist >= 0 / max_off >= 0.
    if max_dist >= 0.0:
        term_b = jnp.maximum(jnp.maximum(med - db, db - (med + max_dist)), zero)
        term_f = jnp.maximum(jnp.maximum(df - med, (med - max_dist) - df), zero)
    else:   # literal two-relu fallback
        term_b = (jnp.maximum(med - db, zero)
                  + jnp.maximum(db - (med + max_dist), zero))
        term_f = (jnp.maximum(df - med, zero)
                  + jnp.maximum((med - max_dist) - df, zero))

    if max_off >= 0.0:
        # relu(x - c) + relu(x + c) == max(2x, x + c, 0) for c >= 0.
        term_o = (jnp.maximum(jnp.maximum(ob + ob, ob + max_off), zero)
                  + jnp.maximum(jnp.maximum(of + of, of + max_off), zero))
    else:   # literal fallback
        term_o = (jnp.maximum(ob - max_off, zero) + jnp.maximum(ob + max_off, zero)
                  + jnp.maximum(of - max_off, zero) + jnp.maximum(of + max_off, zero))

    if uniform:
        contrib = term_b + term_f + term_o          # scaled once in glue
    else:
        contrib = inv_nb * term_b + inv_nf * term_f + inv_no * term_o

    # Mask only the tile that crosses the end of the data (and any duplicated
    # out-of-range tile created by the 2-way core split).
    g = c * tiles_per_core + i
    row_start = g * tile_r
    full = row_start + tile_r <= rows

    @pl.when(full)
    def _acc_full():
        acc_ref[...] += contrib

    @pl.when(jnp.logical_not(full))
    def _acc_tail():
        ridx = row_start + lax.broadcasted_iota(jnp.int32, (tile_r, _LANES), 0)
        acc_ref[...] += jnp.where(ridx < rows, contrib, zero)

    @pl.when(i == pl.num_programs(1) - 1)
    def _finalize():
        # Per-lane column sums; the tiny cross-lane / cross-core sum is in glue.
        out_ref[...] = jnp.sum(acc_ref[...], axis=0, keepdims=True)


def depth_loss_f(depth_back, depth_front, offset_back, offset_front,
                 max_distence_from_mean=0.3, min_distence_from_mean=0.03,
                 max_offset=0.04):
    del min_distence_from_mean  # unused by the reference forward()

    db = jnp.asarray(depth_back).reshape(-1)
    df = jnp.asarray(depth_front).reshape(-1)
    ob = jnp.asarray(offset_back).reshape(-1)
    of = jnp.asarray(offset_front).reshape(-1)

    n_back, n_front = db.shape[0], df.shape[0]
    # Reference divides the whole offset term by the broadcast-sum's size; for
    # equal offset shapes (the only well-defined case) that is offset_back.size.
    n_off = ob.shape[0]

    # median = mean(unique(cat(depth_back, depth_front)))  (no_grad in torch).
    # TODO(synk): torch.unique / jnp.sort have no Pallas TPU equivalent; the
    # O(N log N) sort stays in XLA and dominates end-to-end time for large N.
    cat = jnp.concatenate([db.astype(jnp.float32), df.astype(jnp.float32)])
    srt = jnp.sort(cat)
    uniq = jnp.concatenate([jnp.ones((1,), bool), srt[1:] != srt[:-1]])
    median = jnp.sum(jnp.where(uniq, srt, 0.0)) / jnp.sum(uniq.astype(jnp.float32))
    med1 = jnp.reshape(median, (1,)).astype(jnp.float32)

    # --- lane-dense (rows, 128) slabs; zero-copy in the common case ---------
    max_n = max(n_back, n_front, n_off, of.shape[0])
    rows = pl.cdiv(max_n, _LANES)
    padded_len = rows * _LANES

    # Neutral pad values (padded elements contribute exactly 0 to every term;
    # depth padding additionally assumes max_distence_from_mean >= 0).
    pad_back = median + 0.5 * max_distence_from_mean
    pad_front = median - 0.5 * max_distence_from_mean
    pad_off = -(abs(max_offset) + 1.0)

    def slab(flat, fill):
        pad = padded_len - flat.shape[0]
        if pad:  # only ragged / unequal-size inputs pay this copy
            flat = jnp.concatenate([flat, jnp.full((pad,), fill, flat.dtype)])
        return flat.reshape(rows, _LANES)

    db2 = slab(db, pad_back)
    df2 = slab(df, pad_front)
    ob2 = slab(ob, pad_off)
    of2 = slab(of, pad_off)

    # --- tiling --------------------------------------------------------------
    tile_r = rows if rows <= _MAX_TILE_ROWS else _MAX_TILE_ROWS
    tiles_total = pl.cdiv(rows, tile_r)
    num_partials = 2 if tiles_total >= 2 else 1     # shard across 2 TCs on v7x
    tiles_per_core = pl.cdiv(tiles_total, num_partials)
    last_tile = tiles_total - 1

    uniform = (n_back == n_front == n_off)

    kernel = functools.partial(
        _depth_loss_kernel,
        rows=rows, tile_r=tile_r, tiles_per_core=tiles_per_core,
        uniform=uniform,
        inv_nb=float(1.0 / n_back), inv_nf=float(1.0 / n_front),
        inv_no=float(1.0 / n_off),
        max_dist=float(max_distence_from_mean), max_off=float(max_offset))

    def data_map(c, i):
        # Clamp so a (possibly) over-hanging tile from the 2-way split never
        # maps fully out of bounds; the in-kernel mask zeroes its contribution.
        return (jnp.minimum(c * tiles_per_core + i, last_tile), 0)

    data_spec = pl.BlockSpec((tile_r, _LANES), data_map)

    out = pl.pallas_call(
        kernel,
        out_shape=jax.ShapeDtypeStruct((1, num_partials * _LANES), jnp.float32),
        grid=(num_partials, tiles_per_core),
        in_specs=[
            pl.BlockSpec(memory_space=pltpu.MemorySpace.SMEM),   # median scalar
            data_spec, data_spec, data_spec, data_spec,
        ],
        out_specs=pl.BlockSpec((1, _LANES), lambda c, i: (0, c)),
        scratch_shapes=[pltpu.VMEM((tile_r, _LANES), jnp.float32)],
        compiler_params=pltpu.CompilerParams(
            dimension_semantics=("parallel", "arbitrary"),
            vmem_limit_bytes=32 * 1024 * 1024),
    )(med1, db2, df2, ob2, of2)

    total = jnp.sum(out)
    if uniform:
        total = total * jnp.float32(1.0 / n_back)
    return total


def _reference(depth_back, depth_front, offset_back, offset_front,
               max_dist=0.3, max_off=0.04):
    cat = jnp.concatenate([depth_back.reshape(-1), depth_front.reshape(-1)])
    srt = jnp.sort(cat)
    mask = jnp.concatenate([jnp.array([True]), srt[1:] != srt[:-1]])
    median = jnp.sum(jnp.where(mask, srt, 0.0)) / jnp.sum(mask.astype(jnp.float32))
    lb = (jnp.maximum(median - depth_back, 0.)
          + jnp.maximum(depth_back - (median + max_dist), 0.))
    lf = (jnp.maximum(depth_front - median, 0.)
          + jnp.maximum(median - max_dist - depth_front, 0.))
    lo = (jnp.maximum(offset_back - max_off, 0.)
          + jnp.maximum(offset_front - max_off, 0.)
          + jnp.maximum(offset_back + max_off, 0.)
          + jnp.maximum(offset_front + max_off, 0.))
    return jnp.mean(lb) + jnp.mean(lf) + jnp.mean(lo)


if __name__ == "__main__":
    key = jax.random.PRNGKey(0)
    k1, k2, k3, k4 = jax.random.split(key, 4)
    shape = (2, 4, 16, 16)  # NCHW, 2048 elements per tensor
    depth_back = jax.random.uniform(k1, shape, jnp.float32, 0.0, 2.0)
    depth_front = jax.random.uniform(k2, shape, jnp.float32, 0.0, 2.0)
    offset_back = jax.random.uniform(k3, shape, jnp.float32, -0.1, 0.1)
    offset_front = jax.random.uniform(k4, shape, jnp.float32, -0.1, 0.1)

    loss = depth_loss_f(depth_back, depth_front, offset_back, offset_front)
    loss = jax.block_until_ready(loss)

    ref = _reference(depth_back, depth_front, offset_back, offset_front)
    assert jnp.allclose(loss, ref, rtol=1e-4, atol=1e-5), (loss, ref)
    print("KERNEL_OK")
</pallas_src>

<mosaic_0001>
module attributes {stable_mosaic.version = 11 : i64} {
  func.func @_depth_loss_kernel(%arg0: i32, %arg1: i32, %arg2: memref<1xf32, #tpu.memory_space<smem>>, %arg3: memref<16x128xf32, #tpu.memory_space<vmem>>, %arg4: memref<16x128xf32, #tpu.memory_space<vmem>>, %arg5: memref<16x128xf32, #tpu.memory_space<vmem>>, %arg6: memref<16x128xf32, #tpu.memory_space<vmem>>, %arg7: memref<1x128xf32, #tpu.memory_space<vmem>>, %arg8: memref<16x128xf32, #tpu.memory_space<vmem>>) attributes {dimension_semantics = [#tpu.dimension_semantics<parallel>, #tpu.dimension_semantics<arbitrary>], iteration_bounds = array<i64: 1, 1>, scalar_prefetch = 0 : i64, scratch_operands = 1 : i64, tpu.core_type = #tpu.core_type<tc>, window_params = [{transform_indices = @transform_0, window_bounds = array<i64: 1>}, {transform_indices = @transform_1, window_bounds = array<i64: 16, 128>}, {transform_indices = @transform_2, window_bounds = array<i64: 16, 128>}, {transform_indices = @transform_3, window_bounds = array<i64: 16, 128>}, {transform_indices = @transform_4, window_bounds = array<i64: 16, 128>}, {transform_indices = @transform_5, window_bounds = array<i64: 1, 128>}]} {
    %c0_i32 = arith.constant 0 : i32
    %0 = arith.cmpi eq, %arg1, %c0_i32 : i32
    %1 = arith.extui %0 : i1 to i32
    %c0_i32_0 = arith.constant 0 : i32
    %2 = arith.cmpi ne, %1, %c0_i32_0 : i32
    scf.if %2 {
      %cst_23 = arith.constant 0.000000e+00 : f32
      %52 = vector.broadcast %cst_23 : f32 to vector<16x128xf32>
      %c0_24 = arith.constant 0 : index
      %c0_25 = arith.constant 0 : index
      %53 = vector.load %arg8[%c0_24, %c0_25] : memref<16x128xf32, #tpu.memory_space<vmem>>, vector<16x128xf32>
      tpu.vector_store %arg8[%c0_24, %c0_25], %52 {strides = array<i32>} : memref<16x128xf32, #tpu.memory_space<vmem>>, vector<16x128xf32>,
    } else {
    }
    %c0 = arith.constant 0 : index
    %3 = memref.load %arg2[%c0] : memref<1xf32, #tpu.memory_space<smem>>
    %c0_1 = arith.constant 0 : index
    %c0_2 = arith.constant 0 : index
    %4 = vector.load %arg3[%c0_1, %c0_2] : memref<16x128xf32, #tpu.memory_space<vmem>>, vector<16x128xf32>
    %c0_3 = arith.constant 0 : index
    %c0_4 = arith.constant 0 : index
    %5 = vector.load %arg4[%c0_3, %c0_4] : memref<16x128xf32, #tpu.memory_space<vmem>>, vector<16x128xf32>
    %c0_5 = arith.constant 0 : index
    %c0_6 = arith.constant 0 : index
    %6 = vector.load %arg5[%c0_5, %c0_6] : memref<16x128xf32, #tpu.memory_space<vmem>>, vector<16x128xf32>
    %c0_7 = arith.constant 0 : index
    %c0_8 = arith.constant 0 : index
    %7 = vector.load %arg6[%c0_7, %c0_8] : memref<16x128xf32, #tpu.memory_space<vmem>>, vector<16x128xf32>
    %8 = vector.broadcast %3 : f32 to vector<16x128xf32>
    %9 = arith.subf %8, %4 : vector<16x128xf32>
    %cst = arith.constant 3.000000e-01 : f32
    %10 = arith.addf %3, %cst : f32
    %11 = vector.broadcast %10 : f32 to vector<16x128xf32>
    %12 = arith.subf %4, %11 : vector<16x128xf32>
    %13 = arith.maximumf %9, %12 : vector<16x128xf32>
    %cst_9 = arith.constant 0.000000e+00 : f32
    %14 = vector.broadcast %cst_9 : f32 to vector<16x128xf32>
    %15 = arith.maximumf %13, %14 : vector<16x128xf32>
    %16 = vector.broadcast %3 : f32 to vector<16x128xf32>
    %17 = arith.subf %5, %16 : vector<16x128xf32>
    %cst_10 = arith.constant 3.000000e-01 : f32
    %18 = arith.subf %3, %cst_10 : f32
    %19 = vector.broadcast %18 : f32 to vector<16x128xf32>
    %20 = arith.subf %19, %5 : vector<16x128xf32>
    %21 = arith.maximumf %17, %20 : vector<16x128xf32>
    %cst_11 = arith.constant 0.000000e+00 : f32
    %22 = vector.broadcast %cst_11 : f32 to vector<16x128xf32>
    %23 = arith.maximumf %21, %22 : vector<16x128xf32>
    %24 = arith.addf %6, %6 : vector<16x128xf32>
    %cst_12 = arith.constant 4.000000e-02 : f32
    %25 = vector.broadcast %cst_12 : f32 to vector<16x128xf32>
    %26 = arith.addf %6, %25 : vector<16x128xf32>
    %27 = arith.maximumf %24, %26 : vector<16x128xf32>
    %cst_13 = arith.constant 0.000000e+00 : f32
    %28 = vector.broadcast %cst_13 : f32 to vector<16x128xf32>
    %29 = arith.maximumf %27, %28 : vector<16x128xf32>
    %30 = arith.addf %7, %7 : vector<16x128xf32>
    %cst_14 = arith.constant 4.000000e-02 : f32
    %31 = vector.broadcast %cst_14 : f32 to vector<16x128xf32>
    %32 = arith.addf %7, %31 : vector<16x128xf32>
    %33 = arith.maximumf %30, %32 : vector<16x128xf32>
    %cst_15 = arith.constant 0.000000e+00 : f32
    %34 = vector.broadcast %cst_15 : f32 to vector<16x128xf32>
    %35 = arith.maximumf %33, %34 : vector<16x128xf32>
    %36 = arith.addf %29, %35 : vector<16x128xf32>
    %37 = arith.addf %15, %23 : vector<16x128xf32>
    %38 = arith.addf %37, %36 : vector<16x128xf32>
    %c1_i32 = arith.constant 1 : i32
    %39 = arith.muli %arg0, %c1_i32 : i32
    %40 = arith.addi %39, %arg1 : i32
    %c16_i32 = arith.constant 16 : i32
    %41 = arith.muli %40, %c16_i32 : i32
    %c16_i32_16 = arith.constant 16 : i32
    %42 = arith.addi %41, %c16_i32_16 : i32
    %c16_i32_17 = arith.constant 16 : i32
    %43 = arith.cmpi sle, %42, %c16_i32_17 : i32
    %44 = arith.extui %43 : i1 to i32
    %c0_i32_18 = arith.constant 0 : i32
    %45 = arith.cmpi ne, %44, %c0_i32_18 : i32
    scf.if %45 {
      %c0_23 = arith.constant 0 : index
      %c0_24 = arith.constant 0 : index
      %52 = vector.load %arg8[%c0_23, %c0_24] : memref<16x128xf32, #tpu.memory_space<vmem>>, vector<16x128xf32>
      %53 = arith.addf %52, %38 : vector<16x128xf32>
      %c0_25 = arith.constant 0 : index
      %c0_26 = arith.constant 0 : index
      %54 = vector.load %arg8[%c0_25, %c0_26] : memref<16x128xf32, #tpu.memory_space<vmem>>, vector<16x128xf32>
      tpu.vector_store %arg8[%c0_25, %c0_26], %53 {strides = array<i32>} : memref<16x128xf32, #tpu.memory_space<vmem>>, vector<16x128xf32>,
    } else {
    }
    %true = arith.constant true
    %46 = arith.xori %43, %true : i1
    %47 = arith.extui %46 : i1 to i32
    %cst_19 = arith.constant 0.000000e+00 : f32
    %c0_i32_20 = arith.constant 0 : i32
    %48 = arith.cmpi ne, %47, %c0_i32_20 : i32
    scf.if %48 {
      %52 = tpu.iota {dimensions = array<i32: 0>} : vector<16x128xi32>
      %53 = vector.broadcast %41 : i32 to vector<16x128xi32>
      %54 = arith.addi %53, %52 : vector<16x128xi32>
      %c0_23 = arith.constant 0 : index
      %c0_24 = arith.constant 0 : index
      %55 = vector.load %arg8[%c0_23, %c0_24] : memref<16x128xf32, #tpu.memory_space<vmem>>, vector<16x128xf32>
      %c16_i32_25 = arith.constant 16 : i32
      %56 = vector.broadcast %c16_i32_25 : i32 to vector<16x128xi32>
      %57 = arith.cmpi slt, %54, %56 : vector<16x128xi32>
      %58 = vector.broadcast %cst_19 : f32 to vector<16x128xf32>
      %59 = arith.select %57, %38, %58 : vector<16x128xi1>, vector<16x128xf32>
      %60 = arith.addf %55, %59 : vector<16x128xf32>
      %c0_26 = arith.constant 0 : index
      %c0_27 = arith.constant 0 : index
      %61 = vector.load %arg8[%c0_26, %c0_27] : memref<16x128xf32, #tpu.memory_space<vmem>>, vector<16x128xf32>
      tpu.vector_store %arg8[%c0_26, %c0_27], %60 {strides = array<i32>} : memref<16x128xf32, #tpu.memory_space<vmem>>, vector<16x128xf32>,
    } else {
    }
    %c0_i32_21 = arith.constant 0 : i32
    %49 = arith.cmpi eq, %arg1, %c0_i32_21 : i32
    %50 = arith.extui %49 : i1 to i32
    %c0_i32_22 = arith.constant 0 : i32
    %51 = arith.cmpi ne, %50, %c0_i32_22 : i32
    scf.if %51 {
      %c0_23 = arith.constant 0 : index
      %c0_24 = arith.constant 0 : index
      %52 = vector.load %arg8[%c0_23, %c0_24] : memref<16x128xf32, #tpu.memory_space<vmem>>, vector<16x128xf32>
      %cst_25 = arith.constant dense<0.000000e+00> : vector<128xf32>
      %53 = vector.multi_reduction <add>, %52, %cst_25 [0] : vector<16x128xf32> to vector<128xf32>
      %54 = vector.shape_cast %53 : vector<128xf32> to vector<1x128xf32>
      %c0_26 = arith.constant 0 : index
      %c0_27 = arith.constant 0 : index
      %55 = vector.load %arg7[%c0_26, %c0_27] : memref<1x128xf32, #tpu.memory_space<vmem>>, vector<1x128xf32>
      tpu.vector_store %arg7[%c0_26, %c0_27], %54 {strides = array<i32>} : memref<1x128xf32, #tpu.memory_space<vmem>>, vector<1x128xf32>,
    } else {
    }
    return
  }
  func.func @transform_0(%arg0: i32, %arg1: i32) -> i32 {
    %c0_i32 = arith.constant 0 : i32
    %c0_i32_0 = arith.constant 0 : i32
    return %c0_i32 : i32
  }
  func.func @transform_1(%arg0: i32, %arg1: i32) -> (i32, i32) {
    %c1_i32 = arith.constant 1 : i32
    %0 = arith.muli %arg0, %c1_i32 : i32
    %1 = arith.addi %0, %arg1 : i32
    %c0_i32 = arith.constant 0 : i32
    %2 = arith.minsi %1, %c0_i32 : i32
    %c0_i32_0 = arith.constant 0 : i32
    %c0_i32_1 = arith.constant 0 : i32
    return %2, %c0_i32_0 : i32, i32
  }
  func.func @transform_2(%arg0: i32, %arg1: i32) -> (i32, i32) {
    %c1_i32 = arith.constant 1 : i32
    %0 = arith.muli %arg0, %c1_i32 : i32
    %1 = arith.addi %0, %arg1 : i32
    %c0_i32 = arith.constant 0 : i32
    %2 = arith.minsi %1, %c0_i32 : i32
    %c0_i32_0 = arith.constant 0 : i32
    %c0_i32_1 = arith.constant 0 : i32
    return %2, %c0_i32_0 : i32, i32
  }
  func.func @transform_3(%arg0: i32, %arg1: i32) -> (i32, i32) {
    %c1_i32 = arith.constant 1 : i32
    %0 = arith.muli %arg0, %c1_i32 : i32
    %1 = arith.addi %0, %arg1 : i32
    %c0_i32 = arith.constant 0 : i32
    %2 = arith.minsi %1, %c0_i32 : i32
    %c0_i32_0 = arith.constant 0 : i32
    %c0_i32_1 = arith.constant 0 : i32
    return %2, %c0_i32_0 : i32, i32
  }
  func.func @transform_4(%arg0: i32, %arg1: i32) -> (i32, i32) {
    %c1_i32 = arith.constant 1 : i32
    %0 = arith.muli %arg0, %c1_i32 : i32
    %1 = arith.addi %0, %arg1 : i32
    %c0_i32 = arith.constant 0 : i32
    %2 = arith.minsi %1, %c0_i32 : i32
    %c0_i32_0 = arith.constant 0 : i32
    %c0_i32_1 = arith.constant 0 : i32
    return %2, %c0_i32_0 : i32, i32
  }
  func.func @transform_5(%arg0: i32, %arg1: i32) -> (i32, i32) {
    %c0_i32 = arith.constant 0 : i32
    %c0_i32_0 = arith.constant 0 : i32
    return %c0_i32, %arg0 : i32, i32
  }
}

</mosaic_0001>

<bundles_post_ra>
// kernel: tpu_custom_call.1
= control target key start
LH: loop header
LB: loop body
LE: loop exit
PB: predicated region body
PF: predicated region fallthrough
CT: control target
= control target key end

     0   :  { %11 = vsyncpa [#allocation5], 0  ;;  %s434_s0 = inlined_call_operand.<no memory space> [shape: f32[1], index: 0, kind: input, shape index: {}]   ;;  %s435_s1 = inlined_call_operand.hbm [shape: f32[16,128], index: 1, kind: input, shape index: {}]   ;;  %s436_s2 = inlined_call_operand.hbm [shape: f32[16,128], index: 2, kind: input, shape index: {}]   ;;  %s437_s3 = inlined_call_operand.hbm [shape: f32[16,128], index: 3, kind: input, shape index: {}]   ;;  %s438_s4 = inlined_call_operand.hbm [shape: f32[16,128], index: 4, kind: input, shape index: {}]   ;;  %s439_s5 = inlined_call_operand.hbm [shape: f32[1,128], index: 5, kind: output, shape index: {}]  }
   0x1   :  { %12 = vsyncpa [#allocation8], 0 }
   0x2   :  { %13 = vsyncpa [#allocation11], 0 }
   0x3   :  { %14 = vsyncpa [#allocation6], 0  ;;  %s361_s18 = smov [#allocation7]   ;;  %s362_s20 = smov [#allocation4]  }
   0x4   :  { %s46_s19 = sshll.u32 %s361_s18, 4  ;;  %s28_s21 = sshll.u32 %s362_s20, 4  ;;  %s47_s19 = int_to_ptr.vmem [resolvable:$true] %s46_s19  ;;  %s29_s21 = int_to_ptr.vmem [resolvable:$true] %s28_s21 }
   0x5   :  { %s261_s22 = scalar_lea.vmem %s47_s19, 256  ;;  %p266_p1 = scmp.lt.s32.totalorder %s47_s19, %s47_s19 }
   0x6   :  { %p262_p0 = scmp.ne.s32.totalorder %s47_s19, %s261_s22  ;;  %p267_p2 = scmp.lt.s32.totalorder %s261_s22, %s261_s22 }
   0x8   :  { %p268_p3 = por %p267_p2, %p266_p1 }
   0xa   :  { %p269_p4 = pnand %p268_p3, %p262_p0 }
   0xc   :  { %272 = shalt.err (!%p269_p4)
}
   0xd   :  { %s363_s23 = smov 128   ;;  %s364_s24 = smov 8  }
   0xe   :  { %52 = dma.hbm_to_vmem [thread:$0]  %s436_s2, 256, %s47_s19, [#allocation8], %s363_s23, %s363_s23, %s364_s24  }
   0xf   :  { %s281_s27 = scalar_lea.vmem %s29_s21, 256  ;;  %p286_p6 = scmp.lt.s32.totalorder %s29_s21, %s29_s21 }
  0x10   :  { %p282_p5 = scmp.ne.s32.totalorder %s29_s21, %s281_s27  ;;  %p287_p7 = scmp.lt.s32.totalorder %s281_s27, %s281_s27 }
  0x12   :  { %p288_p8 = por %p287_p7, %p286_p6 }
  0x14   :  { %p289_p9 = pnand %p288_p8, %p282_p5 }
  0x16   :  { %292 = shalt.err (!%p289_p9)
}
  0x17   :  { %34 = dma.hbm_to_vmem [thread:$0]  %s435_s1, 256, %s29_s21, [#allocation5], %s363_s23, %s363_s23, %s364_s24  }
  0x18   :  { %s365_s30 = smov [#allocation9]   ;;  %s366_s7 = smov [#allocation10]  }
  0x19   :  { %s64_s6 = sshll.u32 %s365_s30, 4  ;;  %s82_s8 = sshll.u32 %s366_s7, 4  ;;  %s65_s6 = int_to_ptr.vmem [resolvable:$true] %s64_s6  ;;  %s83_s8 = int_to_ptr.vmem [resolvable:$true] %s82_s8 }
  0x1a   :  { %s301_s2 = scalar_lea.vmem %s65_s6, 256  ;;  %p306_p11 = scmp.lt.s32.totalorder %s65_s6, %s65_s6 }
  0x1b   :  { %p302_p10 = scmp.ne.s32.totalorder %s65_s6, %s301_s2  ;;  %p307_p12 = scmp.lt.s32.totalorder %s301_s2, %s301_s2 }
  0x1d   :  { %p308_p13 = por %p307_p12, %p306_p11 }
  0x1f   :  { %p309_p0 = pnand %p308_p13, %p302_p10 }
  0x21   :  { %312 = shalt.err (!%p309_p0)
}
  0x22   :  { %70 = dma.hbm_to_vmem [thread:$0]  %s437_s3, 256, %s65_s6, [#allocation8], %s363_s23, %s363_s23, %s364_s24  }
  0x23   :  { %s321_s1 = scalar_lea.vmem %s83_s8, 256  ;;  %p326_p2 = scmp.lt.s32.totalorder %s83_s8, %s83_s8 }
  0x24   :  { %p322_p1 = scmp.ne.s32.totalorder %s83_s8, %s321_s1  ;;  %p327_p3 = scmp.lt.s32.totalorder %s321_s1, %s321_s1 }
  0x26   :  { %p328_p4 = por %p327_p3, %p326_p2 }
  0x28   :  { %p329_p5 = pnand %p328_p4, %p322_p1 }
  0x2a   :  { %332 = shalt.err (!%p329_p5)
}
  0x2b   :  { %88 = dma.hbm_to_vmem [thread:$0]  %s438_s4, 256, %s83_s8, [#allocation11], %s363_s23, %s363_s23, %s364_s24  }
  0x2c   :  { %353 = dma.done.wait [#allocation5], 256  }
  0x2d   :  { %354 = vsyncadd [#allocation5], 4294967040 }
  0x2e   :  { %355 = dma.done.wait [#allocation8], 512  }
  0x2f   :  { %356 = vsyncadd [#allocation8], 4294966784 }
  0x30   :  { %357 = dma.done.wait [#allocation11], 256  }
  0x31   :  { %358 = vsyncadd [#allocation11], 4294967040  ;;  %s135_s14 = sadd.f32 0.3, %s434_s0  ;;  %v132_v0 = vstv %s434_s0  ;;  %v124_v3 = vld [vmem:[#allocation4] sm:$0xff]  ;;  %v125_v4 = vld [vmem:[#allocation4 + $0x8] sm:$0xff] }
  0x32   :  { %s245_s17 = sadd.f32 -0.3, %s434_s0  ;;  %v126_v5 = vld [vmem:[#allocation7] sm:$0xff]  ;;  %v127_v6 = vld [vmem:[#allocation7 + $0x8] sm:$0xff]  ;;  %v128_v7 = vld [vmem:[#allocation9] sm:$0xff]  ;;  %v133_v9 = vsub.f32 %v132_v0, %v124_v3  ;;  %v134_v10 = vsub.f32 %v132_v0, %v125_v4  ;;  %s367_s0 = smov [#allocation12]  }
  0x33   :  { %v136_v1 = vstv %s135_s14  ;;  %v129_v8 = vld [vmem:[#allocation9 + $0x8] sm:$0xff]  ;;  %v130_v13 = vld [vmem:[#allocation10] sm:$0xff]  ;;  %v131_v14 = vld [vmem:[#allocation10 + $0x8] sm:$0xff]  ;;  %v143_v15 = vsub.f32 %v126_v5, %v132_v0  ;;  %v144_v16 = vsub.f32 %v127_v6, %v132_v0  ;;  %v153_v21 = vadd.f32 %v128_v7, %v128_v7  ;;  %s226_s4 = sshll.u32 %s367_s0, 4  ;;  %s227_s4 = int_to_ptr.vmem [resolvable:$true] %s226_s4 }
  0x34   :  { %v146_v2 = vstv %s245_s17  ;;  %v137_v11 = vsub.f32 %v124_v3, %v136_v1  ;;  %v138_v12 = vsub.f32 %v125_v4, %v136_v1  ;;  %v154_v22 = vadd.f32 %v129_v8, %v129_v8  ;;  %s333_s20 = scalar_lea.vmem %s227_s4, 16  ;;  %s337_s21 = scalar_lea.vmem %s227_s4, 32 }
  0x35   :  { %v147_v17 = vsub.f32 %v146_v2, %v126_v5  ;;  %v148_v18 = vsub.f32 %v146_v2, %v127_v6  ;;  %v155_v25 = vadd.f32 0.04, %v128_v7  ;;  %v156_v26 = vadd.f32 0.04, %v129_v8  ;;  %p334_p6 = scmp.ne.s32.totalorder %s227_s4, %s333_s20  ;;  %p338_p7 = scmp.lt.s32.totalorder %s227_s4, %s227_s4 }
  0x36   :  { %v139_v19 = vmax.f32 %v133_v9, %v137_v11  ;;  %v140_v20 = vmax.f32 %v134_v10, %v138_v12  ;;  %v161_v27 = vadd.f32 %v130_v13, %v130_v13  ;;  %v162_v28 = vadd.f32 %v131_v14, %v131_v14  ;;  %p339_p8 = scmp.lt.s32.totalorder %s337_s21, %s333_s20 }
  0x37   :  { %v149_v23 = vmax.f32 %v143_v15, %v147_v17  ;;  %v150_v24 = vmax.f32 %v144_v16, %v148_v18  ;;  %v157_v31 = vmax.f32 %v153_v21, %v155_v25  ;;  %v158_v32 = vmax.f32 %v154_v22, %v156_v26 }
  0x38   :  { %v141_v29 = vmax.f32 %v139_v19, 0.0  ;;  %v142_v30 = vmax.f32 %v140_v20, 0.0  ;;  %v163_v35 = vadd.f32 0.04, %v130_v13  ;;  %v164_v36 = vadd.f32 0.04, %v131_v14  ;;  %p340_p9 = por %p339_p8, %p338_p7 }
  0x39   :  { %v151_v33 = vmax.f32 %v149_v23, 0.0  ;;  %v152_v34 = vmax.f32 %v150_v24, 0.0  ;;  %v159_v37 = vmax.f32 %v157_v31, 0.0  ;;  %v160_v38 = vmax.f32 %v158_v32, 0.0 }
  0x3a   :  { %v165_v39 = vmax.f32 %v161_v27, %v163_v35  ;;  %v166_v40 = vmax.f32 %v162_v28, %v164_v36  ;;  %p341_p10 = pnand %p340_p9, %p334_p6 }
  0x3b   :  { %v171_v43 = vadd.f32 %v151_v33, %v141_v29  ;;  %v172_v44 = vadd.f32 %v152_v34, %v142_v30 }
  0x3c   :  { %v167_v41 = vmax.f32 %v165_v39, 0.0  ;;  %v168_v42 = vmax.f32 %v166_v40, 0.0 }
  0x3e   :  { %v169_v45 = vadd.f32 %v167_v41, %v159_v37  ;;  %v170_v46 = vadd.f32 %v168_v42, %v160_v38 }
  0x40   :  { %v173_v47 = vadd.f32 %v171_v43, %v169_v45  ;;  %v174_v48 = vadd.f32 %v172_v44, %v170_v46 }
  0x42   :  { %v212_v49 = vadd.f32 %v174_v48, %v173_v47 }
  0x44   :  { %v213_v50 = vrot.slane %v212_v49, 4 }
  0x46   :  { %v214_v51 = vadd.f32 %v213_v50, %v212_v49 }
  0x48   :  { %v215_v52 = vrot.slane %v214_v51, 2 }
  0x4a   :  { %v216_v53 = vadd.f32 %v215_v52, %v214_v51 }
  0x4c   :  { %v217_v54 = vrot.slane %v216_v53, 1 }
  0x4e   :  { %v218_v55 = vadd.f32 %v217_v54, %v216_v53 }
  0x50   :  { %219 = vst [vmem:[#allocation12] sm:$0x1] %v218_v55 }
  0x51   :  { %344 = shalt.err (!%p341_p10)
}
  0x52   :  { %229 = dma.vmem_to_hbm [thread:$0]  %s227_s4, 16, %s439_s5, [#allocation6]  }
  0x53   :  { %359 = dma.done.wait [#allocation6], 16  }
  0x54   :  { %360 = vsyncadd [#allocation6], 4294967280 }
  0x55   :  { %233 = vsyncpa [#allocation5], 1 }
  0x56   :  { %234 = vsyncpa [#allocation8], 1 }
  0x57   :  { %235 = vsyncpa [#allocation11], 1 }
  0x58   :  { %236 = vsyncpa [#allocation6], 1 }

</bundles_post_ra>
